<compile_context>
chip_gen: v7x
topology: tpu7x:2x2x1
jax: 0.10.0
libtpu: 0.0.40
codegen_flags: <defaults>
</compile_context>

<pallas_src>
import jax
import jax.numpy as jnp
from jax.experimental import pallas as pl
from jax.experimental.pallas import tpu as pltpu

EPS = 1e-5
LANE = 128


def _round_up(n, m):
    return ((n + m - 1) // m) * m


def _ceil_div(a, b):
    return -(-a // b)


# ----------------------------------------------------------------------------
# Kernel: fused (BN-folded) MLP for one batch tile, transposed layout.
#   x_ref  : (IN,  tile_b) bf16      streamed activations (batch in lanes)
#   w1_ref : (L1p, IN)    bf16       resident
#   w2_ref : (L2p, L1p)   bf16       resident
#   w3_ref : (OUTp, L2p)  bf16       resident
#   b_ref  : (BR, 3)      f32        packed biases (columns = layer 1/2/3)
#   o_ref  : (OUTp, tile_b) f32      lane-dense output (batch in lanes)
# ----------------------------------------------------------------------------
def mlp_kernel(x_ref, w1_ref, w2_ref, w3_ref, b_ref, o_ref):
    l1p = w1_ref.shape[0]
    l2p = w2_ref.shape[0]
    outp = w3_ref.shape[0]

    x = x_ref[...]                                                    # bf16
    h = jnp.dot(w1_ref[...], x, preferred_element_type=jnp.float32)  # (L1p, tb) f32
    h = jnp.maximum(h + b_ref[:l1p, 0:1], 0.0).astype(jnp.bfloat16)  # Linear1+ReLU (BN_num folded)
    h = jnp.dot(w2_ref[...], h, preferred_element_type=jnp.float32)  # (L2p, tb) f32
    h = jnp.maximum(h + b_ref[:l2p, 1:2], 0.0).astype(jnp.bfloat16)  # Linear2+ReLU (BN1 folded)
    o = jnp.dot(w3_ref[...], h, preferred_element_type=jnp.float32)  # (OUTp, tb) f32
    o_ref[...] = o + b_ref[:outp, 2:3]                               # Linear3 (BN2 folded)


# ----------------------------------------------------------------------------
# Wrapper: embedding gather (glue, built transposed) + batch-tiled pallas_call.
# ----------------------------------------------------------------------------
def model_forward(x_categorical, x_numerical, params, *, max_tile_b=2048):
    w1t, w2t, w3t = params["w1t"], params["w2t"], params["w3t"]
    bias = params["bias_pack"]
    out_size = params["output_size"]

    L1p, IN = w1t.shape
    L2p = w2t.shape[0]
    OUTp = w3t.shape[0]
    BR = bias.shape[0]
    assert BR >= max(L1p, L2p, OUTp), "bias pack too narrow for padded layer widths"

    B = x_categorical.shape[0]

    # ---- batch tiling: lane-granular, >=2 grid steps when B > 128 (v7x dual-TC),
    #      padding bounded by (n_tiles-1)*128 beyond round_up(B, 128).
    c = _ceil_div(B, LANE)                      # 128-lane chunks needed
    max_c = max(max_tile_b // LANE, 1)
    n_tiles = _ceil_div(c, max_c)
    if c >= 2:
        n_tiles = max(n_tiles, 2)
    tile_b = _ceil_div(c, n_tiles) * LANE
    b_pad = tile_b * n_tiles

    # ---- build the transposed, bf16, batch-padded input (IN, b_pad) directly.
    # nn.Embedding lookups + torch.cat(embeddings, 1); embedding_dropout = identity
    # (eval).  batch_norm_num is folded into W1's numerical rows -> raw numericals.
    pad = b_pad - B
    xc = x_categorical if pad == 0 else jnp.pad(x_categorical, ((0, pad), (0, 0)))
    xn = x_numerical if pad == 0 else jnp.pad(x_numerical, ((0, pad), (0, 0)))
    parts = [jnp.take(tab, xc[:, i], axis=0).T            # (nf_i, b_pad) bf16
             for i, tab in enumerate(params["emb_tables"])]
    parts.append(xn.T.astype(jnp.bfloat16))                # (num_num, b_pad)
    x_t = jnp.concatenate(parts, axis=0)                   # (IN, b_pad) bf16
    # TODO(synk): Linear1 could additionally be folded into the embedding tables
    #             (gather of pre-projected rows) to drop this concat entirely.

    out_t = pl.pallas_call(
        mlp_kernel,
        out_shape=jax.ShapeDtypeStruct((OUTp, b_pad), jnp.float32),
        grid=(n_tiles,),
        in_specs=[
            pl.BlockSpec((IN, tile_b), lambda i: (0, i)),    # streamed activations
            pl.BlockSpec((L1p, IN), lambda i: (0, 0)),       # resident weights
            pl.BlockSpec((L2p, L1p), lambda i: (0, 0)),
            pl.BlockSpec((OUTp, L2p), lambda i: (0, 0)),
            pl.BlockSpec((BR, 3), lambda i: (0, 0)),         # packed biases
        ],
        out_specs=pl.BlockSpec((OUTp, tile_b), lambda i: (0, i)),
        compiler_params=pltpu.CompilerParams(
            dimension_semantics=("parallel",)),
    )(x_t, w1t, w2t, w3t, bias)

    return out_t[:out_size, :B].T                           # (B, output_size) f32


# ----------------------------------------------------------------------------
# Parameter construction (raw, PyTorch-equivalent) and eval-mode folding.
# ----------------------------------------------------------------------------
def init_raw_params(key, embedding_size, num_numerical_cols, output_size, layers):
    num_cat = sum(nf for _, nf in embedding_size)
    input_size = num_cat + num_numerical_cols
    l1, l2 = layers

    keys = jax.random.split(key, len(embedding_size) + 3)
    ki = iter(keys)

    emb_tables = [jax.random.normal(next(ki), (ni, nf), jnp.float32)
                  for ni, nf in embedding_size]

    def lin(k, fan_in, fan_out):
        bound = 1.0 / jnp.sqrt(fan_in)
        kw, kb = jax.random.split(k)
        w = jax.random.uniform(kw, (fan_in, fan_out), jnp.float32, -bound, bound)
        b = jax.random.uniform(kb, (fan_out,), jnp.float32, -bound, bound)
        return w, b

    w1, b1 = lin(next(ki), input_size, l1)
    w2, b2 = lin(next(ki), l1, l2)
    w3, b3 = lin(next(ki), l2, output_size)

    def bn(f):
        return dict(g=jnp.ones((f,), jnp.float32), b=jnp.zeros((f,), jnp.float32),
                    m=jnp.zeros((f,), jnp.float32), v=jnp.ones((f,), jnp.float32))

    return {
        "emb_tables": emb_tables, "num_categorical": num_cat,
        "w1": w1, "b1": b1, "w2": w2, "b2": b2, "w3": w3, "b3": b3,
        "bnN": bn(num_numerical_cols), "bn1": bn(l1), "bn2": bn(l2),
    }


def fold_eval_params(raw, output_size):
    """Fold eval-mode BatchNorms into the Linears; transpose/pad/cast for the kernel."""
    def scale_shift(p):
        s = p["g"] * jax.lax.rsqrt(p["v"] + EPS)
        t = p["b"] - p["m"] * s
        return s, t

    nc = raw["num_categorical"]
    w1, b1 = raw["w1"], raw["b1"]
    w2, b2 = raw["w2"], raw["b2"]
    w3, b3 = raw["w3"], raw["b3"]

    # batch_norm_num -> numerical rows of W1.
    sN, tN = scale_shift(raw["bnN"])
    b1 = b1 + tN @ w1[nc:]
    w1 = jnp.concatenate([w1[:nc], w1[nc:] * sN[:, None]], axis=0)

    # BN1 (post ReLU of layer 1) -> input side of W2.
    s1, t1 = scale_shift(raw["bn1"])
    b2 = b2 + t1 @ w2
    w2 = w2 * s1[:, None]

    # BN2 (post ReLU of layer 2) -> input side of W3.
    s2, t2 = scale_shift(raw["bn2"])
    b3 = b3 + t2 @ w3
    w3 = w3 * s2[:, None]

    IN, L1 = w1.shape
    L2 = w2.shape[1]
    L1p = _round_up(L1, LANE)
    L2p = _round_up(L2, LANE)
    OUTp = _round_up(max(output_size, 1), 8)     # sublane-padded output rows

    # Transposed, zero-padded, bf16 weights (padded rows/cols are exact zeros, so
    # the extra lanes carry 0 through ReLU/matmuls and are sliced off at the end).
    w1t = jnp.zeros((L1p, IN), jnp.float32).at[:L1, :].set(w1.T).astype(jnp.bfloat16)
    w2t = jnp.zeros((L2p, L1p), jnp.float32).at[:L2, :L1].set(w2.T).astype(jnp.bfloat16)
    w3t = (jnp.zeros((OUTp, L2p), jnp.float32)
           .at[:output_size, :L2].set(w3.T).astype(jnp.bfloat16))

    BR = max(L1p, L2p, OUTp)

    def col(v):
        return jnp.zeros((BR,), jnp.float32).at[:v.shape[0]].set(v)

    bias_pack = jnp.stack([col(b1), col(b2), col(b3)], axis=1)   # (BR, 3) f32

    return {
        "emb_tables": [t.astype(jnp.bfloat16) for t in raw["emb_tables"]],
        "w1t": w1t, "w2t": w2t, "w3t": w3t,
        "bias_pack": bias_pack,
        "output_size": output_size,
    }


# ----------------------------------------------------------------------------
# Pure-JAX f32 reference (un-folded eval-mode forward) for a correctness check.
# ----------------------------------------------------------------------------
def reference_forward(x_cat, x_num, raw):
    x_emb = jnp.concatenate(
        [tab[x_cat[:, i]] for i, tab in enumerate(raw["emb_tables"])], axis=1)

    def bn(x, p):
        return (x - p["m"]) * jax.lax.rsqrt(p["v"] + EPS) * p["g"] + p["b"]

    x = jnp.concatenate([x_emb, bn(x_num, raw["bnN"])], axis=1)
    h = jnp.maximum(x @ raw["w1"] + raw["b1"], 0.0)
    h = bn(h, raw["bn1"])
    h = jnp.maximum(h @ raw["w2"] + raw["b2"], 0.0)
    h = bn(h, raw["bn2"])
    return h @ raw["w3"] + raw["b3"]


if __name__ == "__main__":
    # Small shapes consistent with the module's forward.
    embedding_size = [(10, 4), (12, 6), (8, 3)]   # 3 categorical cols -> 13 embedding dims
    num_numerical_cols = 5
    output_size = 2
    layers = [64, 32]
    batch = 8

    key = jax.random.PRNGKey(0)
    kp, kc, kn = jax.random.split(key, 3)

    raw = init_raw_params(kp, embedding_size, num_numerical_cols, output_size, layers)
    params = fold_eval_params(raw, output_size)

    x_categorical = jnp.stack(
        [jax.random.randint(jax.random.fold_in(kc, i), (batch,), 0, ni)
         for i, (ni, _) in enumerate(embedding_size)],
        axis=1,
    )  # (batch, 3) int32
    x_numerical = jax.random.normal(kn, (batch, num_numerical_cols), jnp.float32)

    out = model_forward(x_categorical, x_numerical, params)
    jax.block_until_ready(out)
    assert out.shape == (batch, output_size)

    # Kernel uses bf16 weights/activations (f32 accumulation), so compare against
    # the f32 reference with a bf16-appropriate tolerance.
    ref = reference_forward(x_categorical, x_numerical, raw)
    err = float(jnp.max(jnp.abs(out - ref)))
    assert err < 5e-2, f"mismatch vs reference: max abs err {err}"

    print("KERNEL_OK")
</pallas_src>

<mosaic_0001>
module attributes {stable_mosaic.version = 11 : i64} {
  func.func @mlp_kernel(%arg0: i32, %arg1: memref<18x128xbf16, #tpu.memory_space<vmem>>, %arg2: memref<128x18xbf16, #tpu.memory_space<vmem>>, %arg3: memref<128x128xbf16, #tpu.memory_space<vmem>>, %arg4: memref<8x128xbf16, #tpu.memory_space<vmem>>, %arg5: memref<128x3xf32, #tpu.memory_space<vmem>>, %arg6: memref<8x128xf32, #tpu.memory_space<vmem>>) attributes {dimension_semantics = [#tpu.dimension_semantics<parallel>], iteration_bounds = array<i64: 1>, scalar_prefetch = 0 : i64, scratch_operands = 0 : i64, tpu.core_type = #tpu.core_type<tc>, window_params = [{transform_indices = @transform_0, window_bounds = array<i64: 18, 128>}, {pipeline_mode = #tpu.pipeline_mode<synchronous>, transform_indices = @transform_1, window_bounds = array<i64: 128, 18>}, {pipeline_mode = #tpu.pipeline_mode<synchronous>, transform_indices = @transform_2, window_bounds = array<i64: 128, 128>}, {pipeline_mode = #tpu.pipeline_mode<synchronous>, transform_indices = @transform_3, window_bounds = array<i64: 8, 128>}, {pipeline_mode = #tpu.pipeline_mode<synchronous>, transform_indices = @transform_4, window_bounds = array<i64: 128, 3>}, {transform_indices = @transform_5, window_bounds = array<i64: 8, 128>}]} {
    %c0 = arith.constant 0 : index
    %c0_0 = arith.constant 0 : index
    %0 = vector.load %arg1[%c0, %c0_0] : memref<18x128xbf16, #tpu.memory_space<vmem>>, vector<18x128xbf16>
    %c0_1 = arith.constant 0 : index
    %c0_2 = arith.constant 0 : index
    %1 = vector.load %arg2[%c0_1, %c0_2] : memref<128x18xbf16, #tpu.memory_space<vmem>>, vector<128x18xbf16>
    %cst = arith.constant dense<0.000000e+00> : vector<128x128xf32>
    %2 = tpu.matmul %1, %0, %cst {dimension_numbers = #tpu.dot_dimension_numbers<[1], [0], [0], [1], [0, 0, 1, 1], [], []>} : vector<128x18xbf16>, vector<18x128xbf16>, vector<128x128xf32> -> vector<128x128xf32>
    %c0_3 = arith.constant 0 : index
    %c0_4 = arith.constant 0 : index
    %3 = vector.load %arg5[%c0_3, %c0_4] : memref<128x3xf32, #tpu.memory_space<vmem>>, vector<128x1xf32>
    %4 = vector.broadcast %3 : vector<128x1xf32> to vector<128x128xf32>
    %5 = arith.addf %2, %4 : vector<128x128xf32>
    %cst_5 = arith.constant 0.000000e+00 : f32
    %6 = vector.broadcast %cst_5 : f32 to vector<128x128xf32>
    %7 = arith.maximumf %5, %6 : vector<128x128xf32>
    %8 = arith.truncf %7 : vector<128x128xf32> to vector<128x128xbf16>
    %c0_6 = arith.constant 0 : index
    %c0_7 = arith.constant 0 : index
    %9 = vector.load %arg3[%c0_6, %c0_7] : memref<128x128xbf16, #tpu.memory_space<vmem>>, vector<128x128xbf16>
    %cst_8 = arith.constant dense<0.000000e+00> : vector<128x128xf32>
    %10 = tpu.matmul %9, %8, %cst_8 {dimension_numbers = #tpu.dot_dimension_numbers<[1], [0], [0], [1], [0, 0, 1, 1], [], []>} : vector<128x128xbf16>, vector<128x128xbf16>, vector<128x128xf32> -> vector<128x128xf32>
    %c0_9 = arith.constant 0 : index
    %c1 = arith.constant 1 : index
    %11 = vector.load %arg5[%c0_9, %c1] : memref<128x3xf32, #tpu.memory_space<vmem>>, vector<128x1xf32>
    %12 = vector.broadcast %11 : vector<128x1xf32> to vector<128x128xf32>
    %13 = arith.addf %10, %12 : vector<128x128xf32>
    %cst_10 = arith.constant 0.000000e+00 : f32
    %14 = vector.broadcast %cst_10 : f32 to vector<128x128xf32>
    %15 = arith.maximumf %13, %14 : vector<128x128xf32>
    %16 = arith.truncf %15 : vector<128x128xf32> to vector<128x128xbf16>
    %c0_11 = arith.constant 0 : index
    %c0_12 = arith.constant 0 : index
    %17 = vector.load %arg4[%c0_11, %c0_12] : memref<8x128xbf16, #tpu.memory_space<vmem>>, vector<8x128xbf16>
    %cst_13 = arith.constant dense<0.000000e+00> : vector<8x128xf32>
    %18 = tpu.matmul %17, %16, %cst_13 {dimension_numbers = #tpu.dot_dimension_numbers<[1], [0], [0], [1], [0, 0, 1, 1], [], []>} : vector<8x128xbf16>, vector<128x128xbf16>, vector<8x128xf32> -> vector<8x128xf32>
    %c0_14 = arith.constant 0 : index
    %c2 = arith.constant 2 : index
    %19 = vector.load %arg5[%c0_14, %c2] : memref<128x3xf32, #tpu.memory_space<vmem>>, vector<8x1xf32>
    %20 = vector.broadcast %19 : vector<8x1xf32> to vector<8x128xf32>
    %21 = arith.addf %18, %20 : vector<8x128xf32>
    %c0_15 = arith.constant 0 : index
    %c0_16 = arith.constant 0 : index
    %22 = vector.load %arg6[%c0_15, %c0_16] : memref<8x128xf32, #tpu.memory_space<vmem>>, vector<8x128xf32>
    tpu.vector_store %arg6[%c0_15, %c0_16], %21 {strides = array<i32>} : memref<8x128xf32, #tpu.memory_space<vmem>>, vector<8x128xf32>,
    return
  }
  func.func @transform_0(%arg0: i32) -> (i32, i32) {
    %c0_i32 = arith.constant 0 : i32
    %c0_i32_0 = arith.constant 0 : i32
    return %c0_i32, %arg0 : i32, i32
  }
  func.func @transform_1(%arg0: i32) -> (i32, i32) {
    %c0_i32 = arith.constant 0 : i32
    %c0_i32_0 = arith.constant 0 : i32
    %c0_i32_1 = arith.constant 0 : i32
    return %c0_i32, %c0_i32_0 : i32, i32
  }
  func.func @transform_2(%arg0: i32) -> (i32, i32) {
    %c0_i32 = arith.constant 0 : i32
    %c0_i32_0 = arith.constant 0 : i32
    %c0_i32_1 = arith.constant 0 : i32
    return %c0_i32, %c0_i32_0 : i32, i32
  }
  func.func @transform_3(%arg0: i32) -> (i32, i32) {
    %c0_i32 = arith.constant 0 : i32
    %c0_i32_0 = arith.constant 0 : i32
    %c0_i32_1 = arith.constant 0 : i32
    return %c0_i32, %c0_i32_0 : i32, i32
  }
  func.func @transform_4(%arg0: i32) -> (i32, i32) {
    %c0_i32 = arith.constant 0 : i32
    %c0_i32_0 = arith.constant 0 : i32
    %c0_i32_1 = arith.constant 0 : i32
    return %c0_i32, %c0_i32_0 : i32, i32
  }
  func.func @transform_5(%arg0: i32) -> (i32, i32) {
    %c0_i32 = arith.constant 0 : i32
    %c0_i32_0 = arith.constant 0 : i32
    return %c0_i32, %arg0 : i32, i32
  }
}

</mosaic_0001>

<bundles_post_ra>
// kernel: tpu_custom_call.1
= control target key start
LH: loop header
LB: loop body
LE: loop exit
PB: predicated region body
PF: predicated region fallthrough
CT: control target
= control target key end

     0   :  { %vm211_vm0 = vcmask 1040384   ;;  %vm186_vm1 = vcmask 146432   ;;  %v835_v5 = vmov 0   ;;  %s1010_s0 = inlined_call_operand.vmem [shape: bf16[18,128], index: 0, kind: input, shape index: {}]   ;;  %s1011_s1 = inlined_call_operand.vmem [shape: bf16[128,18], index: 1, kind: input, shape index: {}]   ;;  %s1012_s2 = inlined_call_operand.vmem [shape: bf16[128,128], index: 2, kind: input, shape index: {}]   ;;  %s1013_s3 = inlined_call_operand.vmem [shape: bf16[8,128], index: 3, kind: input, shape index: {}]   ;;  %s1014_s4 = inlined_call_operand.vmem [shape: f32[128,3], index: 4, kind: input, shape index: {}]   ;;  %s1015_s5 = inlined_call_operand.hbm [shape: f32[8,128], index: 5, kind: output, shape index: {}]  }
   0x1   :  { %v793_v0 = vld [vmem:[%s1010_s0] sm:$0xff]   ;;  %v794_v1 = vld [vmem:[%s1010_s0 + $0x8] ss:$0 sps:$4 sm:$0x11]   ;;  %787 = vset.pattern.permute.xlu0 %v835_v5  ;;  %788 = vset.pattern.permute.xlu1 %v835_v5  ;;  %v797_v6 = vld [vmem:[%s1011_s1 + $0x10] sm:$0xff]  }
   0x2   :  { %v795_v2 = vld [vmem:[%s1011_s1] sm:$0xff]   ;;  %708 = vmatprep.subr.bf16.mxu0 %v793_v0  ;;  %v213_v3 = vsel %vm211_vm0, %v794_v1, 0  ;;  %v796_v4 = vld [vmem:[%s1011_s1 + $0x8] sm:$0xff]   ;;  %v43_v8 = vld [vmem:[%s1014_s4 + $0x10] sm:$0xff] }
   0x3   :  { %709 = vmatpush3.bf16.msra.mxu0 %v793_v0  ;;  %712 = vmatprep.mubr.msk.bf16.mxu0 %vm186_vm1, %v795_v2  ;;  %v890_v7 = vld [vmem:[%s1014_s4] sm:$0xff]  ;;  %v42_v9 = vld [vmem:[%s1014_s4 + $0x8] sm:$0xff]  ;;  %v44_v10 = vld [vmem:[%s1014_s4 + $0x18] sm:$0xff] }
   0x4   :  { %780 = vmatprep.subr.msk.bf16.mxu0 %vm211_vm0, %v794_v1  ;;  %59 = vperm.xlu0 %787, %v890_v7   ;;  %v798_v11 = vld [vmem:[%s1011_s1 + $0x18] sm:$0xff]   ;;  %v799_v12 = vld [vmem:[%s1011_s1 + $0x20] sm:$0xff]   ;;  %v46_v14 = vld [vmem:[%s1014_s4 + $0x28] sm:$0xff] }
   0x5   :  { %69 = vperm.xlu1 %788, %v43_v8   ;;  %v45_v13 = vld [vmem:[%s1014_s4 + $0x20] sm:$0xff]  ;;  %v47_v15 = vld [vmem:[%s1014_s4 + $0x30] sm:$0xff]  ;;  %v48_v16 = vld [vmem:[%s1014_s4 + $0x38] sm:$0xff] }
   0x7   :  { %711 = vmatpush3.bf16.msra.mxu0 %v213_v3 }
   0x8   :  { %64 = vperm.xlu0 %787, %v42_v9  }
   0x9   :  { %74 = vperm.xlu1 %788, %v44_v10  }
   0xa   :  { %713 = vmatmul.mubr.msk.bf16.vlgmr.msra.gmra.mrb[0].mxu0 %vm186_vm1, %v796_v4 }
   0xb   :  { %716 = vmatprep.mubr.msk.bf16.mxu0 %vm186_vm1, %v797_v6 }
   0xc   :  { %79 = vperm.xlu0 %787, %v45_v13  }
   0xd   :  { %84 = vperm.xlu1 %788, %v46_v14  }
  0x12   :  { %717 = vmatmul.mubr.msk.bf16.gmra.mrb[4].mxu0 %vm186_vm1, %v798_v11 }
  0x13   :  { %720 = vmatprep.mubr.msk.bf16.mxu0 %vm186_vm1, %v799_v12 }
  0x14   :  { %10 = vsyncpa [#allocation3], 0  ;;  %v800_v17 = vld [vmem:[%s1011_s1 + $0x28] sm:$0xff]   ;;  %89 = vperm.xlu0 %787, %v47_v15   ;;  %v801_v18 = vld [vmem:[%s1011_s1 + $0x30] sm:$0xff]   ;;  %94 = vperm.xlu1 %788, %v48_v16   ;;  %v836_v29 = vmov 1   ;;  %vm838_vm2 = vmmov 0  }
  0x15   :  { %v49_v19 = vld [vmem:[%s1014_s4 + $0x40] sm:$0xff]  ;;  %v50_v20 = vld [vmem:[%s1014_s4 + $0x48] sm:$0xff]  ;;  %v51_v21 = vld [vmem:[%s1014_s4 + $0x50] sm:$0xff]  ;;  %s840_s7 = smov [#allocation2]  }
  0x16   :  { %v52_v22 = vld [vmem:[%s1014_s4 + $0x58] sm:$0xff]  ;;  %v53_v24 = vld [vmem:[%s1014_s4 + $0x60] sm:$0xff]  ;;  %v54_v25 = vld [vmem:[%s1014_s4 + $0x68] sm:$0xff]  ;;  %s639_s8 = sshll.u32 %s840_s7, 4  ;;  %s640_s8 = int_to_ptr.vmem [resolvable:$true] %s639_s8 }
  0x17   :  { %v802_v23 = vld [vmem:[%s1011_s1 + $0x38] sm:$0xff]   ;;  %v55_v26 = vld [vmem:[%s1014_s4 + $0x70] sm:$0xff]  ;;  %v803_v28 = vld [vmem:[%s1012_s2] sm:$0xff]   ;;  %s811_s9 = scalar_lea.vmem %s640_s8, 128  ;;  %p816_p1 = scmp.lt.s32.totalorder %s640_s8, %s640_s8 }
  0x18   :  { %99 = vperm.xlu0 %787, %v49_v19   ;;  %104 = vperm.xlu1 %788, %v50_v20   ;;  %v56_v27 = vld [vmem:[%s1014_s4 + $0x78] sm:$0xff]  ;;  %p812_p0 = scmp.ne.s32.totalorder %s640_s8, %s811_s9  ;;  %p817_p2 = scmp.lt.s32.totalorder %s811_s9, %s811_s9 }
  0x19   :  { %744 = vmatprep.mubr.bf16.mxu1 %v803_v28 }
  0x1a   :  { %721 = vmatmul.mubr.msk.bf16.gmra.mrb[8].mxu0 %vm186_vm1, %v800_v17  ;;  %p818_p3 = por %p817_p2, %p816_p1 }
  0x1b   :  { %724 = vmatprep.mubr.msk.bf16.mxu0 %vm186_vm1, %v801_v18 }
  0x1c   :  { %109 = vperm.xlu0 %787, %v51_v21   ;;  %114 = vperm.xlu1 %788, %v52_v22   ;;  %p819_p4 = pnand %p818_p3, %p812_p0 }
  0x20   :  { %119 = vperm.xlu0 %787, %v53_v24   ;;  %124 = vperm.xlu1 %788, %v54_v25  }
  0x22   :  { %725 = vmatmul.mubr.msk.bf16.gmra.mrb[12].mxu0 %vm186_vm1, %v802_v23 }
  0x24   :  { %129 = vperm.xlu0 %787, %v55_v26   ;;  %134 = vperm.xlu1 %788, %v56_v27  }
  0x28   :  { %790 = vset.pattern.permute.xlu1 %v836_v29  ;;  %789 = vset.pattern.permute.xlu0 %v836_v29 }
  0x29   :  { %357 = vperm.xlu1 %790, %v42_v9   ;;  %353 = vperm.xlu0 %789, %v890_v7  }
  0x2d   :  { %361 = vperm.xlu1 %790, %v43_v8   ;;  %365 = vperm.xlu0 %789, %v44_v10  }
  0x31   :  { %369 = vperm.xlu1 %790, %v45_v13   ;;  %373 = vperm.xlu0 %789, %v46_v14  }
  0x35   :  { %377 = vperm.xlu1 %790, %v47_v15   ;;  %381 = vperm.xlu0 %789, %v48_v16  }
  0x39   :  { %385 = vperm.xlu1 %790, %v49_v19   ;;  %389 = vperm.xlu0 %789, %v50_v20  }
  0x3d   :  { %393 = vperm.xlu1 %790, %v51_v21   ;;  %397 = vperm.xlu0 %789, %v52_v22  }
  0x41   :  { %401 = vperm.xlu1 %790, %v53_v24   ;;  %405 = vperm.xlu0 %789, %v54_v25  }
  0x45   :  { %409 = vperm.xlu1 %790, %v55_v26   ;;  %413 = vperm.xlu0 %789, %v56_v27  }
  0x83   :  { %v60_v30 = vpop.permute.xlu0 %59 }
  0x84   :  { %v70_v31 = vpop.permute.xlu1 %69 }
  0x87   :  { %v65_v32 = vpop.permute.xlu0 %64 }
  0x88   :  { %v75_v33 = vpop.permute.xlu1 %74 }
  0x8b   :  { %v80_v34 = vpop.permute.xlu0 %79 }
  0x8c   :  { %v85_v35 = vpop.permute.xlu1 %84 }
  0x93   :  { %v90_v36 = vpop.permute.xlu0 %89  ;;  %v95_v40 = vpop.permute.xlu1 %94 }
  0x97   :  { %v100_v48 = vpop.permute.xlu0 %99  ;;  %v105_v52 = vpop.permute.xlu1 %104 }
  0x9b   :  { %v110_v61 = vpop.permute.xlu0 %109  ;;  %v115_v1 = vpop.permute.xlu1 %114 }
  0x9f   :  { %v120_v10 = vpop.permute.xlu0 %119  ;;  %v125_v15 = vpop.permute.xlu1 %124 }
  0xa3   :  { %v130_v22 = vpop.permute.xlu0 %129  ;;  %v135_v27 = vpop.permute.xlu1 %134 }
  0xdd   :  { %v714_v37 = vpop.f32.mrb[0].mxu0 }
  0xde   :  { %v258_v38 = vadd.f32 %v714_v37, %v70_v31  ;;  %v249_v39 = vpop.f32.mrb[1].mxu0 }
  0xdf   :  { %v250_v41 = vadd.f32 %v249_v39, %v60_v30  ;;  %v715_v42 = vpop.f32.mrb[2].mxu0  ;;  %v804_v39 = vld [vmem:[%s1012_s2 + $0x8] sm:$0xff]  }
  0xe0   :  { %v261_v43 = vadd.f32 %v715_v42, %v75_v33  ;;  %v252_v44 = vpop.f32.mrb[3].mxu0  ;;  %v314_v46 = vmax.f32 %v258_v38, 0.0  ;;  %v807_v42 = vld [vmem:[%s1012_s2 + $0x20] sm:$0xff]  }
  0xe1   :  { %v253_v45 = vadd.f32 %v252_v44, %v65_v32  ;;  %v312_v49 = vmax.f32 %v250_v41, 0.0  ;;  %v806_v41 = vld [vmem:[%s1012_s2 + $0x18] sm:$0xff]   ;;  %v809_v44 = vld [vmem:[%s1012_s2 + $0x30] sm:$0xff]  }
  0xe2   :  { %v315_v47 = vmax.f32 %v261_v43, 0.0  ;;  %v808_v43 = vld [vmem:[%s1012_s2 + $0x28] sm:$0xff]  }
  0xe3   :  { %v313_v50 = vmax.f32 %v253_v45, 0.0  ;;  %v810_v45 = vld [vmem:[%s1012_s2 + $0x38] sm:$0xff]  }
  0xe4   :  { %v329_v51 = vpack.c.bf16 %v315_v47, %v314_v46  ;;  %v837_v46 = vmov 0.0   ;;  %v839_v47 = vmov 2  }
  0xe5   :  { %v718_v53 = vpop.f32.mrb[4].mxu0  ;;  %v328_v54 = vpack.c.bf16 %v313_v50, %v312_v49  ;;  %760 = vmatprep.subr.bf16.mxu0 %v837_v46  ;;  %776 = vmatprep.mubr.msk.bf16.mxu0 %vm838_vm2, %v837_v46  ;;  %v354_v49 = vpop.permute.xlu0 %353 }
  0xe6   :  { %v274_v55 = vadd.f32 %v718_v53, %v90_v36  ;;  %v265_v56 = vpop.f32.mrb[5].mxu0  ;;  %791 = vset.pattern.permute.xlu1 %v839_v47  ;;  %792 = vset.pattern.permute.xlu0 %v839_v47 }
  0xe7   :  { %v266_v57 = vadd.f32 %v265_v56, %v80_v34  ;;  %v719_v58 = vpop.f32.mrb[6].mxu0  ;;  %728 = vmatprep.subr.bf16.mxu1 %v328_v54  ;;  %589 = vperm.xlu1 %791, %v890_v7  }
  0xe8   :  { %v277_v59 = vadd.f32 %v719_v58, %v95_v40  ;;  %v268_v60 = vpop.f32.mrb[7].mxu0  ;;  %729 = vmatpush3.bf16.msra.mxu1 %v328_v54  ;;  %v318_v63 = vmax.f32 %v274_v55, 0.0  ;;  %v805_v40 = vld [vmem:[%s1012_s2 + $0x10] sm:$0xff]  }
  0xe9   :  { %v269_v62 = vadd.f32 %v268_v60, %v85_v35  ;;  %730 = vmatprep.subr.bf16.mxu1 %v329_v51  ;;  %v316_v2 = vmax.f32 %v266_v57, 0.0 }
  0xea   :  { %v319_v0 = vmax.f32 %v277_v59, 0.0 }
  0xeb   :  { %v317_v3 = vmax.f32 %v269_v62, 0.0 }
  0xec   :  { %v331_v4 = vpack.c.bf16 %v319_v0, %v318_v63  ;;  %731 = vmatpush3.bf16.msra.mxu1 %v329_v51  ;;  %v366_v51 = vpop.permute.xlu0 %365 }
  0xed   :  { %v330_v5 = vpack.c.bf16 %v317_v3, %v316_v2  ;;  %v722_v6 = vpop.f32.mrb[8].mxu0 }
  0xee   :  { %v290_v8 = vadd.f32 %v722_v6, %v110_v61  ;;  %v281_v9 = vpop.f32.mrb[9].mxu0 }
  0xef   :  { %v282_v11 = vadd.f32 %v281_v9, %v100_v48  ;;  %v723_v12 = vpop.f32.mrb[10].mxu0  ;;  %732 = vmatprep.subr.bf16.mxu1 %v330_v5  ;;  %v358_v48 = vpop.permute.xlu1 %357 }
  0xf0   :  { %v293_v13 = vadd.f32 %v723_v12, %v115_v1  ;;  %v284_v14 = vpop.f32.mrb[11].mxu0  ;;  %733 = vmatpush3.bf16.msra.mxu1 %v330_v5  ;;  %v322_v17 = vmax.f32 %v290_v8, 0.0  ;;  %v374_v53 = vpop.permute.xlu0 %373 }
  0xf1   :  { %v285_v16 = vadd.f32 %v284_v14, %v105_v52  ;;  %734 = vmatprep.subr.bf16.mxu1 %v331_v4  ;;  %v320_v19 = vmax.f32 %v282_v11, 0.0 }
  0xf2   :  { %v323_v18 = vmax.f32 %v293_v13, 0.0 }
  0xf3   :  { %v321_v20 = vmax.f32 %v285_v16, 0.0  ;;  %v362_v50 = vpop.permute.xlu1 %361 }
  0xf4   :  { %v333_v21 = vpack.c.bf16 %v323_v18, %v322_v17  ;;  %735 = vmatpush3.bf16.msra.mxu1 %v331_v4  ;;  %v382_v58 = vpop.permute.xlu0 %381 }
  0xf5   :  { %v332_v23 = vpack.c.bf16 %v321_v20, %v320_v19  ;;  %v726_v24 = vpop.f32.mrb[12].mxu0 }
  0xf6   :  { %v306_v25 = vadd.f32 %v726_v24, %v130_v22  ;;  %v297_v26 = vpop.f32.mrb[13].mxu0 }
  0xf7   :  { %v298_v28 = vadd.f32 %v297_v26, %v120_v10  ;;  %v727_v29 = vpop.f32.mrb[14].mxu0  ;;  %736 = vmatprep.subr.bf16.mxu1 %v332_v23  ;;  %v370_v52 = vpop.permute.xlu1 %369 }
  0xf8   :  { %v309_v30 = vadd.f32 %v727_v29, %v135_v27  ;;  %v300_v31 = vpop.f32.mrb[15].mxu0  ;;  %737 = vmatpush3.bf16.msra.mxu1 %v332_v23  ;;  %v326_v33 = vmax.f32 %v306_v25, 0.0  ;;  %v390_v5 = vpop.permute.xlu0 %389 }
  0xf9   :  { %v301_v32 = vadd.f32 %v300_v31, %v125_v15  ;;  %738 = vmatprep.subr.bf16.mxu1 %v333_v21  ;;  %v324_v35 = vmax.f32 %v298_v28, 0.0 }
  0xfa   :  { %v327_v34 = vmax.f32 %v309_v30, 0.0 }
  0xfb   :  { %v325_v36 = vmax.f32 %v301_v32, 0.0  ;;  %v378_v54 = vpop.permute.xlu1 %377 }
  0xfc   :  { %v335_v37 = vpack.c.bf16 %v327_v34, %v326_v33  ;;  %739 = vmatpush3.bf16.msra.mxu1 %v333_v21  ;;  %v398_v19 = vpop.permute.xlu0 %397 }
  0xfd   :  { %v334_v38 = vpack.c.bf16 %v325_v36, %v324_v35 }
  0xff   :  { %740 = vmatprep.subr.bf16.mxu1 %v334_v38  ;;  %v386_v2 = vpop.permute.xlu1 %385 }
 0x100   :  { %741 = vmatpush3.bf16.msra.mxu1 %v334_v38  ;;  %v406_v32 = vpop.permute.xlu0 %405 }
 0x101   :  { %742 = vmatprep.subr.bf16.mxu1 %v335_v37 }
 0x103   :  { %v394_v15 = vpop.permute.xlu1 %393 }
 0x104   :  { %743 = vmatpush3.bf16.msra.mxu1 %v335_v37 }
 0x107   :  { %745 = vmatmul.mubr.bf16.vlgmr.msra.gmra.mrb[0].mxu1 %v804_v39  ;;  %v402_v27 = vpop.permute.xlu1 %401 }
 0x108   :  { %748 = vmatprep.mubr.bf16.mxu1 %v805_v40 }
 0x10b   :  { %v410_v39 = vpop.permute.xlu1 %409 }
 0x10f   :  { %749 = vmatmul.mubr.bf16.gmra.mrb[4].mxu1 %v806_v41 }
 0x110   :  { %752 = vmatprep.mubr.bf16.mxu1 %v807_v42 }
 0x117   :  { %753 = vmatmul.mubr.bf16.gmra.mrb[8].mxu1 %v808_v43 }
 0x118   :  { %756 = vmatprep.mubr.bf16.mxu1 %v809_v44  ;;  %v414_v44 = vpop.permute.xlu0 %413 }
 0x11f   :  { %757 = vmatmul.mubr.bf16.gmra.mrb[12].mxu1 %v810_v45 }
 0x1da   :  { %v746_v55 = vpop.f32.mrb[0].mxu1 }
 0x1db   :  { %v507_v56 = vadd.f32 %v746_v55, %v362_v50  ;;  %v498_v57 = vpop.f32.mrb[1].mxu1 }
 0x1dc   :  { %v499_v59 = vadd.f32 %v498_v57, %v354_v49  ;;  %v747_v60 = vpop.f32.mrb[2].mxu1  ;;  %v585_v57 = vld [vmem:[%s1013_s3] sm:$0xf] }
 0x1dd   :  { %v510_v61 = vadd.f32 %v747_v60, %v366_v51  ;;  %v501_v62 = vpop.f32.mrb[3].mxu1  ;;  %v563_v0 = vmax.f32 %v507_v56, 0.0 }
 0x1de   :  { %v502_v63 = vadd.f32 %v501_v62, %v358_v48  ;;  %v561_v7 = vmax.f32 %v499_v59, 0.0 }
 0x1df   :  { %v564_v1 = vmax.f32 %v510_v61, 0.0 }
 0x1e0   :  { %v562_v3 = vmax.f32 %v502_v63, 0.0 }
 0x1e1   :  { %v578_v4 = vpack.c.bf16 %v564_v1, %v563_v0 }
 0x1e2   :  { %v577_v6 = vpack.c.bf16 %v562_v3, %v561_v7  ;;  %v750_v8 = vpop.f32.mrb[4].mxu1 }
 0x1e3   :  { %v523_v9 = vadd.f32 %v750_v8, %v378_v54  ;;  %v514_v10 = vpop.f32.mrb[5].mxu1 }
 0x1e4   :  { %v515_v11 = vadd.f32 %v514_v10, %v370_v52  ;;  %v751_v12 = vpop.f32.mrb[6].mxu1  ;;  %761 = vmatpush3.bf16.msra.mxu0 %v577_v6 }
 0x1e5   :  { %v526_v13 = vadd.f32 %v751_v12, %v382_v58  ;;  %v517_v14 = vpop.f32.mrb[7].mxu1  ;;  %762 = vmatprep.subr.bf16.mxu0 %v837_v46  ;;  %v567_v17 = vmax.f32 %v523_v9, 0.0  ;;  %v590_v58 = vpop.permute.xlu1 %589 }
 0x1e6   :  { %v518_v16 = vadd.f32 %v517_v14, %v374_v53  ;;  %v565_v20 = vmax.f32 %v515_v11, 0.0 }
 0x1e7   :  { %v568_v18 = vmax.f32 %v526_v13, 0.0 }
 0x1e8   :  { %v566_v21 = vmax.f32 %v518_v16, 0.0  ;;  %763 = vmatpush3.bf16.msra.mxu0 %v578_v4 }
 0x1e9   :  { %v580_v22 = vpack.c.bf16 %v568_v18, %v567_v17  ;;  %764 = vmatprep.subr.bf16.mxu0 %v837_v46 }
 0x1ea   :  { %v579_v23 = vpack.c.bf16 %v566_v21, %v565_v20  ;;  %v754_v24 = vpop.f32.mrb[8].mxu1 }
 0x1eb   :  { %v539_v25 = vadd.f32 %v754_v24, %v394_v15  ;;  %v530_v26 = vpop.f32.mrb[9].mxu1 }
 0x1ec   :  { %v531_v28 = vadd.f32 %v530_v26, %v386_v2  ;;  %v755_v29 = vpop.f32.mrb[10].mxu1  ;;  %765 = vmatpush3.bf16.msra.mxu0 %v579_v23 }
 0x1ed   :  { %v542_v30 = vadd.f32 %v755_v29, %v398_v19  ;;  %v533_v31 = vpop.f32.mrb[11].mxu1  ;;  %766 = vmatprep.subr.bf16.mxu0 %v837_v46  ;;  %v571_v34 = vmax.f32 %v539_v25, 0.0 }
 0x1ee   :  { %v534_v33 = vadd.f32 %v533_v31, %v390_v5  ;;  %v569_v36 = vmax.f32 %v531_v28, 0.0 }
 0x1ef   :  { %v572_v35 = vmax.f32 %v542_v30, 0.0 }
 0x1f0   :  { %v570_v37 = vmax.f32 %v534_v33, 0.0  ;;  %767 = vmatpush3.bf16.msra.mxu0 %v580_v22 }
 0x1f1   :  { %v582_v38 = vpack.c.bf16 %v572_v35, %v571_v34  ;;  %768 = vmatprep.subr.bf16.mxu0 %v837_v46 }
 0x1f2   :  { %v581_v40 = vpack.c.bf16 %v570_v37, %v569_v36  ;;  %v758_v41 = vpop.f32.mrb[12].mxu1 }
 0x1f3   :  { %v555_v42 = vadd.f32 %v758_v41, %v410_v39  ;;  %v546_v43 = vpop.f32.mrb[13].mxu1 }
 0x1f4   :  { %v547_v45 = vadd.f32 %v546_v43, %v402_v27  ;;  %v759_v47 = vpop.f32.mrb[14].mxu1  ;;  %769 = vmatpush3.bf16.msra.mxu0 %v581_v40 }
 0x1f5   :  { %v558_v48 = vadd.f32 %v759_v47, %v414_v44  ;;  %v549_v49 = vpop.f32.mrb[15].mxu1  ;;  %770 = vmatprep.subr.bf16.mxu0 %v837_v46  ;;  %v575_v51 = vmax.f32 %v555_v42, 0.0 }
 0x1f6   :  { %v550_v50 = vadd.f32 %v549_v49, %v406_v32  ;;  %v573_v53 = vmax.f32 %v547_v45, 0.0 }
 0x1f7   :  { %v576_v52 = vmax.f32 %v558_v48, 0.0 }
 0x1f8   :  { %v574_v54 = vmax.f32 %v550_v50, 0.0  ;;  %771 = vmatpush3.bf16.msra.mxu0 %v582_v38 }
 0x1f9   :  { %v584_v55 = vpack.c.bf16 %v576_v52, %v575_v51  ;;  %772 = vmatprep.subr.bf16.mxu0 %v837_v46 }
 0x1fa   :  { %v583_v56 = vpack.c.bf16 %v574_v54, %v573_v53 }
 0x1fc   :  { %773 = vmatpush3.bf16.msra.mxu0 %v583_v56 }
 0x1fd   :  { %774 = vmatprep.subr.bf16.mxu0 %v837_v46 }
 0x200   :  { %775 = vmatpush3.bf16.msra.mxu0 %v584_v55 }
 0x203   :  { %777 = vmatmul.mubr.bf16.vlgmr.msra.gmra.mrb[16].mxu0 %v585_v57 }
 0x2d6   :  { %v626_v59 = vpop.f32.mrb[16].mxu0 }
 0x2d7   :  { %v627_v60 = vadd.f32 %v626_v59, %v590_v58  ;;  %v778_v61 = vpop.f32.mrb[17].mxu0 }
 0x2d8   :  { %v629_v62 = vpop.f32.mrb[18].mxu0 }
 0x2d9   :  { %632 = vst [vmem:[#allocation2] sm:$0xff] %v627_v60  ;;  %v779_v63 = vpop.f32.mrb[19].mxu0 }
 0x2da   :  { %822 = shalt.err (!%p819_p4)
}
 0x2db   :  { %s823_s11 = scalar_lea.hbm %s1015_s5, 128 }
 0x2dc   :  { %p824_p5 = scmp.ne.s32.totalorder %s1015_s5, %s823_s11  ;;  %p827_p6 = scmp.lt.u32.totalorder %s823_s11, %s1015_s5 }
 0x2de   :  { %p829_p7 = pnand %p827_p6, %p824_p5 }
 0x2e0   :  { %832 = shalt.err (!%p829_p7)
}
 0x2e1   :  { %642 = dma.vmem_to_hbm [thread:$0]  %s640_s8, 128, %s1015_s5, [#allocation3]  }
 0x2e2   :  { %833 = dma.done.wait [#allocation3], 128  }
 0x2e3   :  { %834 = vsyncadd [#allocation3], 4294967168 }
 0x2e4   :  { %646 = vsyncpa [#allocation3], 1 }

</bundles_post_ra>
